<compile_context>
chip_gen: v6e
topology: v6e:2x2x1
jax: 0.10.0
libtpu: 0.0.40
codegen_flags: <defaults>
</compile_context>

<pallas_src>
import jax
import jax.numpy as jnp
from jax.experimental import pallas as pl
from jax.experimental.pallas import tpu as pltpu

_VMEM_LIMIT_BYTES = 32 * 1024 * 1024   # explicit scoped-VMEM budget, safe on v5e/v6e/v7x


# --------------------------------------------------------------------------- kernels
def _pool_kernel(x_ref, sum_ref):
    """Per-sample, per-channel spatial sum.  sum_ref (1, C, 1) is revisited across the
    HW grid axis (accumulator pattern)."""
    h = pl.program_id(1)

    @pl.when(h == 0)
    def _():
        sum_ref[...] = jnp.zeros_like(sum_ref)

    x = x_ref[0].astype(jnp.float32)                                  # (C, THW)
    sum_ref[0] = sum_ref[0] + jnp.sum(x, axis=-1, keepdims=True)      # (C, 1)


def _apply_kernel(x_ref, ws_ref, bs_ref, cse_ref, o_ref):
    """out = x * (cSE_gate + sigmoid(ws @ x + bs)) on a (C, THW) tile (HW = lane axis)."""
    x = x_ref[0]                                                      # (C, THW), native dtype
    s = jnp.dot(ws_ref[...], x, preferred_element_type=jnp.float32) + bs_ref[...]
    sse = jax.nn.sigmoid(s)                                           # (C, THW) f32 (EUP)
    gate = cse_ref[0] + sse                                           # (C,1)+(C,THW) broadcast
    o_ref[0] = (x.astype(jnp.float32) * gate).astype(o_ref.dtype)     # fused x*(cse+sse)


# --------------------------------------------------------------------------- wrapper
def _pick_hw_tile(hw, c, itemsize, vmem_budget=8 * 1024 * 1024):
    """Largest multiple of 128 dividing hw such that ~4 double-buffered (C, THW)
    blocks (input + output) stay within the VMEM budget."""
    if hw % 128 != 0:
        # Fall back to a single full-extent block (correct; only hits small/odd shapes).
        return hw
    max_t = max(128, vmem_budget // (4 * c * itemsize))
    best, t = 128, 128
    while t <= min(hw, max_t):
        if hw % t == 0:
            best = t
        t += 128
    return best


def scse_forward(x_nchw, params, hw_tile=None):
    N, C, H, W = x_nchw.shape
    HW = H * W
    x = x_nchw.reshape(N, C, HW)        # free view: NCHW kept, no transpose/relayout

    thw = hw_tile if hw_tile is not None else _pick_hw_tile(
        HW, C, jnp.dtype(x.dtype).itemsize)
    assert HW % thw == 0, "HW tile must divide H*W"
    n_hw = HW // thw

    # ---- pass 1: global average pool (Pallas reduction over the HW tiles) ----
    sums = pl.pallas_call(
        _pool_kernel,
        out_shape=jax.ShapeDtypeStruct((N, C, 1), jnp.float32),
        grid_spec=pltpu.PrefetchScalarGridSpec(
            num_scalar_prefetch=0,
            grid=(N, n_hw),
            in_specs=[pl.BlockSpec((1, C, thw), lambda n, h: (n, 0, h))],
            out_specs=pl.BlockSpec((1, C, 1), lambda n, h: (n, 0, 0)),
        ),
        compiler_params=pltpu.CompilerParams(
            dimension_semantics=("parallel", "arbitrary"),
            vmem_limit_bytes=_VMEM_LIMIT_BYTES),
    )(x)

    # ---- cSE gate: tiny (N,C)/(N,mid) matmuls; negligible, done in the wrapper
    #      (per perf review: "effectively vector ops", not worth kernel effort) ----
    pooled = sums[:, :, 0] * (1.0 / HW)                                   # (N, C)
    hmid = jax.nn.relu(pooled @ params["w1"].T + params["b1"])            # (N, mid)
    cse = jax.nn.sigmoid(hmid @ params["w2"].T + params["b2"])            # (N, C)
    cse = cse[:, :, None].astype(jnp.float32)                             # (N, C, 1)

    ws = params["ws"].astype(x.dtype)                 # (C, C)  (bf16 x -> bf16 MXU path)
    bs = params["bs"].reshape(C, 1).astype(jnp.float32)

    # ---- pass 2: sSE matmul + fused gating, tiled over (N, HW) ----
    out = pl.pallas_call(
        _apply_kernel,
        out_shape=jax.ShapeDtypeStruct((N, C, HW), x.dtype),
        grid_spec=pltpu.PrefetchScalarGridSpec(
            num_scalar_prefetch=0,
            grid=(N, n_hw),
            in_specs=[
                pl.BlockSpec((1, C, thw), lambda n, h: (n, 0, h)),   # x tile
                pl.BlockSpec((C, C), lambda n, h: (0, 0)),           # ws (resident)
                pl.BlockSpec((C, 1), lambda n, h: (0, 0)),           # bs
                pl.BlockSpec((1, C, 1), lambda n, h: (n, 0, 0)),     # cSE gate
            ],
            out_specs=pl.BlockSpec((1, C, thw), lambda n, h: (n, 0, h)),
        ),
        compiler_params=pltpu.CompilerParams(
            dimension_semantics=("parallel", "parallel"),
            vmem_limit_bytes=_VMEM_LIMIT_BYTES),
    )(x, ws, bs, cse)

    return out.reshape(N, C, H, W)


# --------------------------------------------------------------------------- params / reference
def init_params(key, ch, re=16):
    # Deterministic init mimicking PyTorch Conv2d default (uniform +- 1/sqrt(fan_in)).
    mid = ch // re
    ks = jax.random.split(key, 6)

    def u(k, shape, fan_in):
        bound = 1.0 / jnp.sqrt(jnp.float32(fan_in))
        return jax.random.uniform(k, shape, jnp.float32, -bound, bound)

    return {
        "w1": u(ks[0], (mid, ch), ch),    # Conv2d(ch, ch//re, 1).weight[:, :, 0, 0]
        "b1": u(ks[1], (mid,), ch),
        "w2": u(ks[2], (ch, mid), mid),   # Conv2d(ch//re, ch, 1).weight[:, :, 0, 0]
        "b2": u(ks[3], (ch,), mid),
        "ws": u(ks[4], (ch, ch), ch),     # Conv2d(ch, ch, 1).weight[:, :, 0, 0]
        "bs": u(ks[5], (ch,), ch),
    }


def scse_reference(x, p):
    # Pure-JAX reference (matches the provided PyTorch spec, where sSE is Conv2d(ch, ch, 1)).
    pooled = jnp.mean(x, axis=(2, 3))                                  # (N, C)
    h = jnp.maximum(pooled @ p["w1"].T + p["b1"], 0.0)                 # (N, mid)
    cse = jax.nn.sigmoid(h @ p["w2"].T + p["b2"])[:, :, None, None]    # (N, C, 1, 1)
    sse = jax.nn.sigmoid(
        jnp.einsum("nchw,oc->nohw", x, p["ws"]) + p["bs"][None, :, None, None])
    return x * cse + x * sse


if __name__ == "__main__":
    key = jax.random.PRNGKey(0)
    k_x, k_p = jax.random.split(key)

    N, C, H, W = 2, 32, 16, 16            # ch=32, re=16 -> mid=2; HW=256
    x = jax.random.normal(k_x, (N, C, H, W), jnp.float32)
    params = init_params(k_p, C, re=16)

    # hw_tile=128 -> grid=(N, 2): exercises the multi-tile HW path (pool accumulation
    # + tiled apply) even at this small test size.
    out = scse_forward(x, params, hw_tile=128)
    out = jax.block_until_ready(out)

    ref = scse_reference(x, params)
    assert out.shape == ref.shape
    assert jnp.allclose(out, ref, atol=1e-5, rtol=1e-5)

    print("KERNEL_OK")
</pallas_src>

<mosaic_0001>
module attributes {stable_mosaic.version = 11 : i64} {
  func.func @_pool_kernel(%arg0: i32, %arg1: i32, %arg2: memref<1x32x128xf32, #tpu.memory_space<vmem>>, %arg3: memref<1x32x1xf32, #tpu.memory_space<vmem>>) attributes {dimension_semantics = [#tpu.dimension_semantics<parallel>, #tpu.dimension_semantics<arbitrary>], iteration_bounds = array<i64: 2, 2>, scalar_prefetch = 0 : i64, scratch_operands = 0 : i64, tpu.core_type = #tpu.core_type<tc>, window_params = [{transform_indices = @transform_0, window_bounds = array<i64: 1, 32, 128>}, {transform_indices = @transform_1, window_bounds = array<i64: 1, 32, 1>}]} {
    %c0_i32 = arith.constant 0 : i32
    %0 = arith.cmpi eq, %arg1, %c0_i32 : i32
    %1 = arith.extui %0 : i1 to i32
    %c0_i32_0 = arith.constant 0 : i32
    %2 = arith.cmpi ne, %1, %c0_i32_0 : i32
    scf.if %2 {
      %cst_9 = arith.constant 0.000000e+00 : f32
      %13 = vector.broadcast %cst_9 : f32 to vector<1x32x1xf32>
      %c0_10 = arith.constant 0 : index
      %c0_11 = arith.constant 0 : index
      %c0_12 = arith.constant 0 : index
      %14 = vector.load %arg3[%c0_10, %c0_11, %c0_12] : memref<1x32x1xf32, #tpu.memory_space<vmem>>, vector<1x32x1xf32>
      tpu.vector_store %arg3[%c0_10, %c0_11, %c0_12], %13 {strides = array<i32>} : memref<1x32x1xf32, #tpu.memory_space<vmem>>, vector<1x32x1xf32>,
    } else {
    }
    %c0 = arith.constant 0 : index
    %c0_1 = arith.constant 0 : index
    %c0_2 = arith.constant 0 : index
    %3 = vector.load %arg2[%c0, %c0_1, %c0_2] : memref<1x32x128xf32, #tpu.memory_space<vmem>>, vector<1x32x128xf32>
    %4 = vector.shape_cast %3 : vector<1x32x128xf32> to vector<32x128xf32>
    %c0_3 = arith.constant 0 : index
    %c0_4 = arith.constant 0 : index
    %c0_5 = arith.constant 0 : index
    %5 = vector.load %arg3[%c0_3, %c0_4, %c0_5] : memref<1x32x1xf32, #tpu.memory_space<vmem>>, vector<1x32x1xf32>
    %6 = vector.shape_cast %5 : vector<1x32x1xf32> to vector<32x1xf32>
    %cst = arith.constant dense<0.000000e+00> : vector<32xf32>
    %7 = vector.multi_reduction <add>, %4, %cst [1] : vector<32x128xf32> to vector<32xf32>
    %8 = vector.shape_cast %7 : vector<32xf32> to vector<32x1xf32>
    %9 = arith.addf %6, %8 : vector<32x1xf32>
    %c0_6 = arith.constant 0 : index
    %c0_7 = arith.constant 0 : index
    %c0_8 = arith.constant 0 : index
    %10 = vector.load %arg3[%c0_6, %c0_7, %c0_8] : memref<1x32x1xf32, #tpu.memory_space<vmem>>, vector<1x32x1xf32>
    %11 = vector.shape_cast %10 : vector<1x32x1xf32> to vector<32x1xf32>
    %12 = vector.shape_cast %9 : vector<32x1xf32> to vector<1x32x1xf32>
    tpu.vector_store %arg3[%c0_6, %c0_7, %c0_8], %12 {strides = array<i32>} : memref<1x32x1xf32, #tpu.memory_space<vmem>>, vector<1x32x1xf32>,
    return
  }
  func.func @transform_0(%arg0: i32, %arg1: i32) -> (i32, i32, i32) {
    %c0_i32 = arith.constant 0 : i32
    %c0_i32_0 = arith.constant 0 : i32
    return %arg0, %c0_i32, %arg1 : i32, i32, i32
  }
  func.func @transform_1(%arg0: i32, %arg1: i32) -> (i32, i32, i32) {
    %c0_i32 = arith.constant 0 : i32
    %c0_i32_0 = arith.constant 0 : i32
    %c0_i32_1 = arith.constant 0 : i32
    return %arg0, %c0_i32, %c0_i32_0 : i32, i32, i32
  }
}

</mosaic_0001>

<bundles_post_ra>
// kernel: tpu_custom_call.1
= control target key start
LH: loop header
LB: loop body
LE: loop exit
PB: predicated region body
PF: predicated region fallthrough
CT: control target
= control target key end

     0   :  { %6 = vsyncpa [#allocation3], 0  ;;  %s605_s0 = inlined_call_operand.hbm [shape: f32[2,32,256], index: 0, kind: input, shape index: {}]   ;;  %s606_s1 = inlined_call_operand.vmem [shape: f32[2,32,1], index: 1, kind: output, shape index: {}]  }
   0x1   :  { %8 = vsyncpa [#allocation3 + $0x1], 0  ;;  %s467_s6 = smov 0   ;;  %s469_s7 = smov 0  }
   0x2   :  { %s471_s8 = smov 0   ;;  %s473_s9 = smov 0  }
   0x3   :  { %s475_s10 = smov 0   ;;  %s477_s11 = smov 0  }
   0x4   :  { %s479_s12 = smov 0   ;;  %s481_s13 = smov 0  }
   0x5 LB: > { %s266_s14 = sadd.s32 4294967295, %s450_s13   ;;  %s23_s15 = sadd.s32 1, %s442_s11  ;;  %s450_s13 = sphi %s481_s13, %s14_s13   ;;  %s446_s12 = sphi %s479_s12, %s616_s12   ;;  %s442_s11 = sphi %s477_s11, %s615_s11   ;;  %s438_s10 = sphi %s475_s10, %s614_s10   ;;  %s434_s9 = sphi %s473_s9, %s613_s9   ;;  %s430_s8 = sphi %s471_s8, %s612_s8   ;;  %s426_s7 = sphi %s469_s7, %s611_s7   ;;  %s422_s6 = sphi %s467_s6, %s610_s6  }
   0x6   : > { %p24_p0 = scmp.ge.s32.totalorder %s23_s15, 2  ;;  %s26_s16 = sadd.s32 1, %s446_s12 }
   0x7   : > { %s35_s17 = sadd.s32 1, %s430_s8  ;;  %p42_p1 = scmp.ne.s32.totalorder %s430_s8, %s426_s7 }
   0x8   : > { %s618_s15 = smov (%p24_p0, %s23_s15), 0  ;;  %s620_s16 = smov (!%p24_p0, %s26_s16), %s446_s12 }
   0x9   : > { %s31_s18 = ssub.s32 %s442_s11, %s618_s15  ;;  %p43_p2 = scmp.eq.s32.totalorder %s450_s13, 0 }
   0xa   : > { %p28_p3 = scmp.ge.s32.totalorder %s620_s16, 2  ;;  %p48_p4 = scmp.ne.s32.totalorder %s426_s7, %s422_s6 }
   0xb   : > { %p518_p5 = por %p43_p2, %p42_p1  ;;  %p49_p6 = scmp.eq.s32.totalorder %s266_s14, 0 }
   0xc   : > { %s622_s16 = smov (%p28_p3, %s620_s16), 0  ;;  %p287_p8 = scmp.lt.s32.totalorder %s450_s13, 4 }
   0xd   : > { %p524_p7 = por %p49_p6, %p48_p4  ;;  %s30_s21 = ssub.s32 %s446_s12, %s622_s16 }
   0xe   : > { %s32_s22 = sor.u32 %s31_s18, %s30_s21  ;;  %s98_s23 = sand.u32 1, %s430_s8  }
   0xf   : > { %p33_p9 = scmp.eq.s32.totalorder %s32_s22, 0  ;;  %s270_s24 = sshll.u32 %s98_s23, 5 }
  0x10   : > { %s271_s25 = sshll.u32 %s446_s12, 3  ;;  %s102_s29 = scalar_lea.vmem [#allocation2], %s270_s24 }
  0x11   : > { %s534_s26 = scalar_select %p33_p9, %s430_s8, %s35_s17  }
  0x12   : > { %s107_s27 = sadd.s32 %s442_s11, %s271_s25  ;;  %s110_s30 = sshll.u32 %s102_s29, 4  ;;  %s111_s30 = int_to_ptr.vmem [resolvable:$true] %s110_s30 }
  0x13   : > { %s272_s28 = sshll.u32 %s107_s27, 7  ;;  %p544_p10 = pnand %p287_p8, %p518_p5 }
  0x14   : > { %s109_s4 = scalar_lea.hbm %s605_s0, %s272_s28  ;;  %p273_p11 = scmp.ge.s32.totalorder %s450_s13, 1 }
  0x15   : > { %s99_s6 = scalar_lea.sflag [#allocation3], %s98_s23  ;;  %p358_p12 = pneg %p544_p10 }
  0x16   : > { %s369_s14 = scalar_lea.vmem %s111_s30, 512  ;;  %s452_s17 = smov [#allocation2]  }
  0x17   : > { %p370_p13 = scmp.ne.s32.totalorder %s111_s30, %s369_s14  ;;  %s374_s18 = sshll.u32 %s452_s17, 4  ;;  %s375_s18 = int_to_ptr.vmem [resolvable:$false] %s374_s18 }
  0x18   : > { %s376_s21 = scalar_lea.vmem %s375_s18, 1024  ;;  %p377_p2 = scmp.lt.s32.totalorder %s111_s30, %s375_s18 }
  0x19   : > { %p372_p0 = pnand %p370_p13, %p358_p12  ;;  %p378_p3 = scmp.lt.s32.totalorder %s376_s21, %s369_s14 }
  0x1b   : > { %p373_p1 = pneg %p372_p0  ;;  %p379_p4 = por %p378_p3, %p377_p2 }
  0x1d   : > { %p380_p5 = pnand %p379_p4, %p373_p1 }
  0x1f   : > { %383 = shalt.err (!%p380_p5)
}
  0x20   : > { %s453_s19 = smov 256   ;;  %s454_s22 = smov 128  }
  0x21   : > { %s455_s23 = smov 8   ;;  %p118_p6 = scmp.lt.s32.totalorder %s450_s13, 5 }
  0x22   : > { %286 = dma.hbm_to_vmem [thread:$0]  (!%p544_p10), %s109_s4, 512, %s111_s30, %s99_s6, %s453_s19, %s454_s22, %s455_s23  }
  0x23   : > { %p119_p8 = pnand %p273_p11, %p118_p6 }
  0x24   : > { %s124_s24 = sand.u32 (!%p119_p8), 1, %s426_s7  }
  0x25   : > { %122 = sbr.rel (%p119_p8) target bundleno = 199 (0xc7), region = 24  ;;  %s274_s25 = sshll.u32 (!%p119_p8), %s124_s24, 5 }
  0x26   : > { %s125_s27 = scalar_lea.sflag (!%p119_p8), [#allocation3], %s124_s24  ;;  %s128_s28 = scalar_lea.vmem (!%p119_p8), [#allocation2], %s274_s25 }
  0x2a   : > { %417 = dma.done.wait (%p524_p7), %s125_s27, 512  }
  0x2b   : > { %419 = vsyncadd (%p524_p7), %s125_s27, 4294966784  ;;  %p147_p9 = scmp.lt.s32.totalorder %s438_s10, 1  ;;  %p277_p10 = scmp.ne.s32.totalorder %s434_s9, 0 }
  0x2d   : > { %s624_s10 = smov (!%p147_p9, %s438_s10), 1  ;;  %155 = sbr.rel (%p277_p10) target bundleno = 53 (0x35), region = 32 }
  0x2e   : > { %s280_s29 = sshll.u32 %s624_s10, 5 }
  0x2f   : > { %s566_s3 = scalar_lea.vmem %s606_s1, %s280_s29 }
  0x32   : > { %vm156_vm0 = vcmask 7168   ;;  %v456_v0 = vmov 0.0  }
  0x33   : > { %157 = vst.msk [vmem:[%s566_s3] sm:$0xff] %vm156_vm0, %v456_v0  ;;  %158 = vst.msk [vmem:[%s566_s3 + $0x8] sm:$0xff] %vm156_vm0, %v456_v0 }
  0x34   : > { %159 = vst.msk [vmem:[%s566_s3 + $0x10] sm:$0xff] %vm156_vm0, %v456_v0  ;;  %160 = vst.msk [vmem:[%s566_s3 + $0x18] sm:$0xff] %vm156_vm0, %v456_v0 }
  0x35 PF: > { %v163_v1 = vld [vmem:[%s128_s28 + $0x10] sm:$0xff]  ;;  %v161_v2 = vld [vmem:[%s128_s28] sm:$0xff]  ;;  %v164_v3 = vld [vmem:[%s128_s28 + $0x18] sm:$0xff]  ;;  %vm181_vm1 = vcmask 7168  }
  0x36   : > { %173 = vadd.xlane.f32.xlu1 %v163_v1  ;;  %169 = vadd.xlane.f32.xlu0 %v161_v2  ;;  %v162_v4 = vld [vmem:[%s128_s28 + $0x8] sm:$0xff] }
  0x3a   : > { %175 = vadd.xlane.f32.xlu1 %v164_v3  ;;  %171 = vadd.xlane.f32.xlu0 %v162_v4  ;;  %v165_v6 = vld [vmem:[%s566_s3] sm:$0xff]  ;;  %v166_v12 = vld [vmem:[%s566_s3 + $0x8] sm:$0xff] }
  0x3b   : > { %v167_v5 = vld [vmem:[%s566_s3 + $0x10] sm:$0xff]  ;;  %v168_v11 = vld [vmem:[%s566_s3 + $0x18] sm:$0xff] }
  0xbf   : > { %v174_v7 = vpop.xlane.xlu1 %173  ;;  %v170_v8 = vpop.xlane.xlu0 %169 }
  0xc0   : > { %v179_v9 = vadd.f32 %v174_v7, %v167_v5  ;;  %v177_v10 = vadd.f32 %v170_v8, %v165_v6 }
  0xc2   : > { %184 = vst.msk [vmem:[%s566_s3 + $0x10] sm:$0xff] %vm181_vm1, %v179_v9  ;;  %182 = vst.msk [vmem:[%s566_s3] sm:$0xff] %vm181_vm1, %v177_v10 }
  0xc3   : > { %v176_v13 = vpop.xlane.xlu1 %175  ;;  %v172_v14 = vpop.xlane.xlu0 %171 }
  0xc4   : > { %v180_v15 = vadd.f32 %v176_v13, %v168_v11  ;;  %v178_v16 = vadd.f32 %v172_v14, %v166_v12 }
  0xc6   : > { %185 = vst.msk [vmem:[%s566_s3 + $0x18] sm:$0xff] %vm181_vm1, %v180_v15  ;;  %183 = vst.msk [vmem:[%s566_s3 + $0x8] sm:$0xff] %vm181_vm1, %v178_v16 }
  0xc7 PF: > { %s14_s13 = sadd.s32 1, %s450_s13   ;;  %s610_s6 = smov %s426_s7 }
  0xc8   : > { %p11_p7 = scmp.ge.s32.totalorder %s14_s13, 6   ;;  %s611_s7 = smov %s430_s8 }
  0xc9   : > { %s612_s8 = smov %s534_s26  ;;  %s613_s9 = smov %s442_s11 }
  0xca   : > { %s614_s10 = smov %s446_s12  ;;  %s615_s11 = smov %s618_s15 }
  0xcb   : > { %s616_s12 = smov %s622_s16  ;;  %13 = sbr.rel (!%p11_p7) target bundleno = 5 (0x5), region = 68 }
  0xd0   :  { %207 = vsyncpa [#allocation3], 1 }
  0xd1   :  { %209 = vsyncpa [#allocation3 + $0x1], 1 }

</bundles_post_ra>
